<compile_context>
chip_gen: v7x
topology: tpu7x:2x2x1
jax: 0.10.0
libtpu: 0.0.40
codegen_flags: <defaults>
</compile_context>

<pallas_src>
import jax
import jax.numpy as jnp
from jax.experimental import pallas as pl
from jax.experimental.pallas import tpu as pltpu


# ----------------------------- Pallas kernel --------------------------------
def _nqp_kernel(hist_ref, nq_ref,
                w_hp_ref, b_hp_ref,
                w1u_ref, w1q_ref, b1_ref,
                w2_ref, b2_ref,
                pred_ref, prof_ref):
    # ---- HistoryProcessor: sum over sequence (1/S folded into w_hp), Linear, ReLU
    hist = hist_ref[...].astype(jnp.float32)          # bf16 stream -> f32 accumulate
    h_sum = jnp.sum(hist, axis=1)                     # (TB, DH)

    z_hp = jnp.dot(h_sum, w_hp_ref[...],
                   preferred_element_type=jnp.float32) + b_hp_ref[...]
    user_profile = jnp.maximum(z_hp, 0.0)             # (TB, HID)

    # ---- PerformancePredictor layer 1 on [profile ; nq] (split matmul) ----
    z1 = (jnp.dot(user_profile, w1u_ref[...], preferred_element_type=jnp.float32)
          + jnp.dot(nq_ref[...].astype(jnp.float32), w1q_ref[...],
                    preferred_element_type=jnp.float32)
          + b1_ref[...])
    h1 = jnp.maximum(z1, 0.0)                         # (TB, HID2)

    # ---- N=1 output head: VPU multiply + lane reduction (no MXU) ----
    z2 = jnp.sum(h1 * w2_ref[...], axis=-1, keepdims=True) + b2_ref[...]
    pred_ref[...] = jax.nn.sigmoid(z2)                # (TB, 1)
    prof_ref[...] = user_profile                      # (TB, HID)


# ------------------------------ Helpers --------------------------------------
def _round_up(x, m):
    return ((x + m - 1) // m) * m


def _choose_tiling(B, S, DH, DQ, HID, stream_itemsize):
    """Pick (block_b, padded_B).  Prefer a tile that divides the 8-rounded batch
    (no large pad copy); fall back to tile-multiple padding only if needed."""
    # Double-buffered VMEM bytes per batch row of the streamed arrays.
    row_bytes = (2 * S * DH * stream_itemsize     # history (x2 pipeline buffers)
                 + 2 * DQ * 4                     # nq
                 + 2 * (1 + HID) * 4)             # prediction + user_profile outputs
    budget = 32 * 1024 * 1024                     # safe on v5e/v6e (128 MiB) and v7x (64 MiB)
    cap = max(8, min(((budget // max(row_bytes, 1)) // 8) * 8, 512))

    bp8 = _round_up(max(B, 1), 8)
    if bp8 <= cap:                                # single tile, <= 7 padded rows
        return bp8, bp8

    # Largest multiple of 8 that divides the 8-rounded batch and fits the budget.
    best = 8
    tb = cap
    while tb >= 8:
        if bp8 % tb == 0:
            best = tb
            break
        tb -= 8
    if best >= 64:                                # good divisor -> negligible pad
        return best, bp8

    # Fall back: pad batch to a multiple of a well-sized tile.
    tb = min(cap, 256)
    return tb, _round_up(B, tb)


# ------------------------------ Wrapper --------------------------------------
def next_question_prediction(history, nq, params, return_user_profile=False,
                             block_b=None, stream_dtype=jnp.bfloat16):
    B, S, DH = history.shape
    DQ = nq.shape[1]
    HID = params["w_hp"].shape[1]
    HID2 = params["w1u"].shape[1]
    stream_itemsize = jnp.dtype(stream_dtype).itemsize

    if block_b is None:
        block_b, Bp = _choose_tiling(B, S, DH, DQ, HID, stream_itemsize)
    else:
        block_b = max(8, (block_b // 8) * 8)
        Bp = _round_up(B, block_b)

    # Pad batch up to the padded size (padded rows are sliced off below).
    hist_in = history
    nq_in = nq
    if Bp != B:
        hist_in = jnp.pad(hist_in, ((0, Bp - B), (0, 0), (0, 0)))
        nq_in = jnp.pad(nq_in, ((0, Bp - B), (0, 0)))
    hist_in = hist_in.astype(stream_dtype)            # stream history as bf16

    # Fold the 1/S of the mean into the weight (exact: the mean is linear).
    w_hp = (params["w_hp"].astype(jnp.float32) / jnp.float32(S))
    # Output head weight as a (1, HID2) row for the VPU multiply + reduce.
    w2_row = params["w2"].astype(jnp.float32).reshape(1, HID2)

    nb = Bp // block_b

    grid_spec = pltpu.PrefetchScalarGridSpec(
        num_scalar_prefetch=0,
        grid=(nb,),
        in_specs=[
            # streamed per-tile inputs
            pl.BlockSpec((block_b, S, DH), lambda i: (i, 0, 0)),   # history
            pl.BlockSpec((block_b, DQ), lambda i: (i, 0)),         # nq
            # VMEM-resident weights / biases (constant index_map)
            pl.BlockSpec((DH, HID), lambda i: (0, 0)),             # w_hp (pre-scaled)
            pl.BlockSpec((1, HID), lambda i: (0, 0)),              # b_hp
            pl.BlockSpec((HID, HID2), lambda i: (0, 0)),           # w1u
            pl.BlockSpec((DQ, HID2), lambda i: (0, 0)),            # w1q
            pl.BlockSpec((1, HID2), lambda i: (0, 0)),             # b1
            pl.BlockSpec((1, HID2), lambda i: (0, 0)),             # w2 (row layout)
            pl.BlockSpec((1, 1), lambda i: (0, 0)),                # b2
        ],
        out_specs=(
            pl.BlockSpec((block_b, 1), lambda i: (i, 0)),          # prediction
            pl.BlockSpec((block_b, HID), lambda i: (i, 0)),        # user_profile
        ),
    )

    # VMEM budget: streamed tiles + resident weights, 2x headroom, capped
    # below v7x's 64 MiB physical VMEM.
    weight_bytes = 4 * (DH * HID + HID + HID * HID2 + DQ * HID2 + 2 * HID2 + 1)
    est = (block_b * (2 * S * DH * stream_itemsize + 2 * DQ * 4 + 2 * (1 + HID) * 4)
           + 2 * weight_bytes)
    vmem_limit = int(min(max(2 * est, 16 << 20), 48 << 20))

    # Advisory cost for the XLA scheduler.
    flops = 2 * Bp * (S * DH + DH * HID + HID * HID2 + DQ * HID2 + HID2)
    bytes_accessed = (Bp * S * DH * stream_itemsize + Bp * DQ * 4
                      + weight_bytes + Bp * (1 + HID) * 4)
    cost = pl.CostEstimate(flops=flops, transcendentals=Bp,
                           bytes_accessed=bytes_accessed)

    pred, prof = pl.pallas_call(
        _nqp_kernel,
        out_shape=(
            jax.ShapeDtypeStruct((Bp, 1), jnp.float32),     # prediction
            jax.ShapeDtypeStruct((Bp, HID), jnp.float32),   # user_profile
        ),
        grid_spec=grid_spec,
        compiler_params=pltpu.CompilerParams(
            dimension_semantics=("parallel",),              # megacore batch sharding
            vmem_limit_bytes=vmem_limit,
        ),
        cost_estimate=cost,
    )(hist_in, nq_in,
      w_hp, params["b_hp"],
      params["w1u"], params["w1q"], params["b1"],
      w2_row, params["b2"])

    pred = pred[:B]
    prof = prof[:B]
    if return_user_profile:
        return pred, prof
    return pred


# --------------------------- Parameter init ----------------------------------
def init_params(key, dh, dq, hid, hid2):
    ks = jax.random.split(key, 5)
    scale = 0.1
    return {
        # HistoryProcessor linear: DH -> HID   (stored (in, out), i.e. W.T)
        "w_hp": scale * jax.random.normal(ks[0], (dh, hid), jnp.float32),
        "b_hp": jnp.zeros((1, hid), jnp.float32),
        # PerformancePredictor layer 1: [HID ; DQ] -> HID2 (split weights)
        "w1u": scale * jax.random.normal(ks[1], (hid, hid2), jnp.float32),
        "w1q": scale * jax.random.normal(ks[2], (dq, hid2), jnp.float32),
        "b1": jnp.zeros((1, hid2), jnp.float32),
        # PerformancePredictor layer 2: HID2 -> 1
        "w2": scale * jax.random.normal(ks[3], (hid2, 1), jnp.float32),
        "b2": jnp.zeros((1, 1), jnp.float32),
    }


# --------------------------- Pure-JAX reference -------------------------------
def _ref(history, nq, p):
    h_mean = jnp.mean(history, axis=1)
    prof = jnp.maximum(h_mean @ p["w_hp"] + p["b_hp"], 0.0)
    h1 = jnp.maximum(prof @ p["w1u"] + nq @ p["w1q"] + p["b1"], 0.0)
    return jax.nn.sigmoid(h1 @ p["w2"] + p["b2"]), prof


if __name__ == "__main__":
    B, S, DH, DQ, HID, HID2 = 8, 8, 32, 16, 32, 32

    key = jax.random.PRNGKey(0)
    k_hist, k_nq, k_par = jax.random.split(key, 3)

    history = jax.random.normal(k_hist, (B, S, DH), jnp.float32)
    nq = jax.random.normal(k_nq, (B, DQ), jnp.float32)
    params = init_params(k_par, DH, DQ, HID, HID2)

    pred, prof = next_question_prediction(history, nq, params,
                                          return_user_profile=True)
    pred = jax.block_until_ready(pred)
    prof = jax.block_until_ready(prof)

    # Reference on the same bf16-quantized history the kernel streams (exact
    # comparison of the streaming path; accumulation is f32 in both).
    hist_q = history.astype(jnp.bfloat16).astype(jnp.float32)
    ref_pred, ref_prof = _ref(hist_q, nq, params)
    assert jnp.allclose(pred, ref_pred, atol=1e-5, rtol=1e-5)
    assert jnp.allclose(prof, ref_prof, atol=1e-5, rtol=1e-5)

    # Sanity check against the full-f32 module semantics (loose tol for the
    # bf16 input quantization only).
    ref_pred_f32, ref_prof_f32 = _ref(history, nq, params)
    assert jnp.allclose(pred, ref_pred_f32, atol=2e-2, rtol=2e-2)
    assert jnp.allclose(prof, ref_prof_f32, atol=2e-2, rtol=2e-2)

    print("KERNEL_OK")
</pallas_src>

<mosaic_0001>
module attributes {stable_mosaic.version = 11 : i64} {
  func.func @_nqp_kernel(%arg0: i32, %arg1: memref<8x8x32xbf16, #tpu.memory_space<vmem>>, %arg2: memref<8x16xf32, #tpu.memory_space<vmem>>, %arg3: memref<32x32xf32, #tpu.memory_space<vmem>>, %arg4: memref<1x32xf32, #tpu.memory_space<vmem>>, %arg5: memref<32x32xf32, #tpu.memory_space<vmem>>, %arg6: memref<16x32xf32, #tpu.memory_space<vmem>>, %arg7: memref<1x32xf32, #tpu.memory_space<vmem>>, %arg8: memref<1x32xf32, #tpu.memory_space<vmem>>, %arg9: memref<1x1xf32, #tpu.memory_space<vmem>>, %arg10: memref<8x1xf32, #tpu.memory_space<vmem>>, %arg11: memref<8x32xf32, #tpu.memory_space<vmem>>) attributes {dimension_semantics = [#tpu.dimension_semantics<parallel>], iteration_bounds = array<i64: 1>, scalar_prefetch = 0 : i64, scratch_operands = 0 : i64, tpu.core_type = #tpu.core_type<tc>, window_params = [{transform_indices = @transform_0, window_bounds = array<i64: 8, 8, 32>}, {transform_indices = @transform_1, window_bounds = array<i64: 8, 16>}, {pipeline_mode = #tpu.pipeline_mode<synchronous>, transform_indices = @transform_2, window_bounds = array<i64: 32, 32>}, {pipeline_mode = #tpu.pipeline_mode<synchronous>, transform_indices = @transform_3, window_bounds = array<i64: 1, 32>}, {pipeline_mode = #tpu.pipeline_mode<synchronous>, transform_indices = @transform_4, window_bounds = array<i64: 32, 32>}, {pipeline_mode = #tpu.pipeline_mode<synchronous>, transform_indices = @transform_5, window_bounds = array<i64: 16, 32>}, {pipeline_mode = #tpu.pipeline_mode<synchronous>, transform_indices = @transform_6, window_bounds = array<i64: 1, 32>}, {pipeline_mode = #tpu.pipeline_mode<synchronous>, transform_indices = @transform_7, window_bounds = array<i64: 1, 32>}, {pipeline_mode = #tpu.pipeline_mode<synchronous>, transform_indices = @transform_8, window_bounds = array<i64: 1, 1>}, {transform_indices = @transform_9, window_bounds = array<i64: 8, 1>}, {transform_indices = @transform_10, window_bounds = array<i64: 8, 32>}]} {
    %c0 = arith.constant 0 : index
    %c0_0 = arith.constant 0 : index
    %c0_1 = arith.constant 0 : index
    %0 = vector.load %arg1[%c0, %c0_0, %c0_1] : memref<8x8x32xbf16, #tpu.memory_space<vmem>>, vector<8x8x32xbf16>
    %1 = arith.extf %0 : vector<8x8x32xbf16> to vector<8x8x32xf32>
    %cst = arith.constant dense<0.000000e+00> : vector<8x32xf32>
    %2 = vector.multi_reduction <add>, %1, %cst [1] : vector<8x8x32xf32> to vector<8x32xf32>
    %c0_2 = arith.constant 0 : index
    %c0_3 = arith.constant 0 : index
    %3 = vector.load %arg3[%c0_2, %c0_3] : memref<32x32xf32, #tpu.memory_space<vmem>>, vector<32x32xf32>
    %cst_4 = arith.constant dense<0.000000e+00> : vector<8x32xf32>
    %4 = tpu.matmul %2, %3, %cst_4 {dimension_numbers = #tpu.dot_dimension_numbers<[1], [0], [0], [1], [0, 0, 1, 1], [], []>} : vector<8x32xf32>, vector<32x32xf32>, vector<8x32xf32> -> vector<8x32xf32>
    %c0_5 = arith.constant 0 : index
    %c0_6 = arith.constant 0 : index
    %5 = vector.load %arg4[%c0_5, %c0_6] : memref<1x32xf32, #tpu.memory_space<vmem>>, vector<1x32xf32>
    %6 = vector.broadcast %5 : vector<1x32xf32> to vector<8x32xf32>
    %7 = arith.addf %4, %6 : vector<8x32xf32>
    %cst_7 = arith.constant 0.000000e+00 : f32
    %8 = vector.broadcast %cst_7 : f32 to vector<8x32xf32>
    %9 = arith.maximumf %7, %8 : vector<8x32xf32>
    %c0_8 = arith.constant 0 : index
    %c0_9 = arith.constant 0 : index
    %10 = vector.load %arg5[%c0_8, %c0_9] : memref<32x32xf32, #tpu.memory_space<vmem>>, vector<32x32xf32>
    %cst_10 = arith.constant dense<0.000000e+00> : vector<8x32xf32>
    %11 = tpu.matmul %9, %10, %cst_10 {dimension_numbers = #tpu.dot_dimension_numbers<[1], [0], [0], [1], [0, 0, 1, 1], [], []>} : vector<8x32xf32>, vector<32x32xf32>, vector<8x32xf32> -> vector<8x32xf32>
    %c0_11 = arith.constant 0 : index
    %c0_12 = arith.constant 0 : index
    %12 = vector.load %arg2[%c0_11, %c0_12] : memref<8x16xf32, #tpu.memory_space<vmem>>, vector<8x16xf32>
    %c0_13 = arith.constant 0 : index
    %c0_14 = arith.constant 0 : index
    %13 = vector.load %arg6[%c0_13, %c0_14] : memref<16x32xf32, #tpu.memory_space<vmem>>, vector<16x32xf32>
    %cst_15 = arith.constant dense<0.000000e+00> : vector<8x32xf32>
    %14 = tpu.matmul %12, %13, %cst_15 {dimension_numbers = #tpu.dot_dimension_numbers<[1], [0], [0], [1], [0, 0, 1, 1], [], []>} : vector<8x16xf32>, vector<16x32xf32>, vector<8x32xf32> -> vector<8x32xf32>
    %15 = arith.addf %11, %14 : vector<8x32xf32>
    %c0_16 = arith.constant 0 : index
    %c0_17 = arith.constant 0 : index
    %16 = vector.load %arg7[%c0_16, %c0_17] : memref<1x32xf32, #tpu.memory_space<vmem>>, vector<1x32xf32>
    %17 = vector.broadcast %16 : vector<1x32xf32> to vector<8x32xf32>
    %18 = arith.addf %15, %17 : vector<8x32xf32>
    %cst_18 = arith.constant 0.000000e+00 : f32
    %19 = vector.broadcast %cst_18 : f32 to vector<8x32xf32>
    %20 = arith.maximumf %18, %19 : vector<8x32xf32>
    %c0_19 = arith.constant 0 : index
    %c0_20 = arith.constant 0 : index
    %21 = vector.load %arg8[%c0_19, %c0_20] : memref<1x32xf32, #tpu.memory_space<vmem>>, vector<1x32xf32>
    %22 = vector.broadcast %21 : vector<1x32xf32> to vector<8x32xf32>
    %23 = arith.mulf %20, %22 : vector<8x32xf32>
    %cst_21 = arith.constant dense<0.000000e+00> : vector<8xf32>
    %24 = vector.multi_reduction <add>, %23, %cst_21 [1] : vector<8x32xf32> to vector<8xf32>
    %25 = vector.shape_cast %24 : vector<8xf32> to vector<8x1xf32>
    %c0_22 = arith.constant 0 : index
    %c0_23 = arith.constant 0 : index
    %26 = vector.load %arg9[%c0_22, %c0_23] : memref<1x1xf32, #tpu.memory_space<vmem>>, vector<1x1xf32>
    %27 = vector.broadcast %26 : vector<1x1xf32> to vector<8x1xf32>
    %28 = arith.addf %25, %27 : vector<8x1xf32>
    %29 = arith.negf %28 : vector<8x1xf32>
    %30 = math.exp %29 : vector<8x1xf32>
    %cst_24 = arith.constant 1.000000e+00 : f32
    %31 = vector.broadcast %cst_24 : f32 to vector<8x1xf32>
    %32 = arith.addf %31, %30 : vector<8x1xf32>
    %33 = arith.divf %31, %32 : vector<8x1xf32>
    %c0_25 = arith.constant 0 : index
    %c0_26 = arith.constant 0 : index
    %34 = vector.load %arg10[%c0_25, %c0_26] : memref<8x1xf32, #tpu.memory_space<vmem>>, vector<8x1xf32>
    tpu.vector_store %arg10[%c0_25, %c0_26], %33 {strides = array<i32>} : memref<8x1xf32, #tpu.memory_space<vmem>>, vector<8x1xf32>,
    %c0_27 = arith.constant 0 : index
    %c0_28 = arith.constant 0 : index
    %35 = vector.load %arg11[%c0_27, %c0_28] : memref<8x32xf32, #tpu.memory_space<vmem>>, vector<8x32xf32>
    tpu.vector_store %arg11[%c0_27, %c0_28], %9 {strides = array<i32>} : memref<8x32xf32, #tpu.memory_space<vmem>>, vector<8x32xf32>,
    return
  }
  func.func @transform_0(%arg0: i32) -> (i32, i32, i32) {
    %c0_i32 = arith.constant 0 : i32
    %c0_i32_0 = arith.constant 0 : i32
    %c0_i32_1 = arith.constant 0 : i32
    return %arg0, %c0_i32, %c0_i32_0 : i32, i32, i32
  }
  func.func @transform_1(%arg0: i32) -> (i32, i32) {
    %c0_i32 = arith.constant 0 : i32
    %c0_i32_0 = arith.constant 0 : i32
    return %arg0, %c0_i32 : i32, i32
  }
  func.func @transform_2(%arg0: i32) -> (i32, i32) {
    %c0_i32 = arith.constant 0 : i32
    %c0_i32_0 = arith.constant 0 : i32
    %c0_i32_1 = arith.constant 0 : i32
    return %c0_i32, %c0_i32_0 : i32, i32
  }
  func.func @transform_3(%arg0: i32) -> (i32, i32) {
    %c0_i32 = arith.constant 0 : i32
    %c0_i32_0 = arith.constant 0 : i32
    %c0_i32_1 = arith.constant 0 : i32
    return %c0_i32, %c0_i32_0 : i32, i32
  }
  func.func @transform_4(%arg0: i32) -> (i32, i32) {
    %c0_i32 = arith.constant 0 : i32
    %c0_i32_0 = arith.constant 0 : i32
    %c0_i32_1 = arith.constant 0 : i32
    return %c0_i32, %c0_i32_0 : i32, i32
  }
  func.func @transform_5(%arg0: i32) -> (i32, i32) {
    %c0_i32 = arith.constant 0 : i32
    %c0_i32_0 = arith.constant 0 : i32
    %c0_i32_1 = arith.constant 0 : i32
    return %c0_i32, %c0_i32_0 : i32, i32
  }
  func.func @transform_6(%arg0: i32) -> (i32, i32) {
    %c0_i32 = arith.constant 0 : i32
    %c0_i32_0 = arith.constant 0 : i32
    %c0_i32_1 = arith.constant 0 : i32
    return %c0_i32, %c0_i32_0 : i32, i32
  }
  func.func @transform_7(%arg0: i32) -> (i32, i32) {
    %c0_i32 = arith.constant 0 : i32
    %c0_i32_0 = arith.constant 0 : i32
    %c0_i32_1 = arith.constant 0 : i32
    return %c0_i32, %c0_i32_0 : i32, i32
  }
  func.func @transform_8(%arg0: i32) -> (i32, i32) {
    %c0_i32 = arith.constant 0 : i32
    %c0_i32_0 = arith.constant 0 : i32
    %c0_i32_1 = arith.constant 0 : i32
    return %c0_i32, %c0_i32_0 : i32, i32
  }
  func.func @transform_9(%arg0: i32) -> (i32, i32) {
    %c0_i32 = arith.constant 0 : i32
    %c0_i32_0 = arith.constant 0 : i32
    return %arg0, %c0_i32 : i32, i32
  }
  func.func @transform_10(%arg0: i32) -> (i32, i32) {
    %c0_i32 = arith.constant 0 : i32
    %c0_i32_0 = arith.constant 0 : i32
    return %arg0, %c0_i32 : i32, i32
  }
}

</mosaic_0001>

<bundles_post_ra>
// kernel: tpu_custom_call.1
= control target key start
LH: loop header
LB: loop body
LE: loop exit
PB: predicated region body
PF: predicated region fallthrough
CT: control target
= control target key end

     0   :  { %s882_s0 = inlined_call_operand.hbm [shape: bf16[8,8,32], index: 0, kind: input, shape index: {}]   ;;  %s883_s1 = inlined_call_operand.hbm [shape: f32[8,16], index: 1, kind: input, shape index: {}]   ;;  %s884_s2 = inlined_call_operand.hbm [shape: f32[32,32], index: 2, kind: input, shape index: {}]   ;;  %s885_s3 = inlined_call_operand.vmem [shape: f32[1,32], index: 3, kind: input, shape index: {}]   ;;  %s886_s4 = inlined_call_operand.hbm [shape: f32[32,32], index: 4, kind: input, shape index: {}]   ;;  %s887_s5 = inlined_call_operand.vmem [shape: f32[16,32], index: 5, kind: input, shape index: {}]   ;;  %s888_s6 = inlined_call_operand.vmem [shape: f32[1,32], index: 6, kind: input, shape index: {}]   ;;  %s889_s7 = inlined_call_operand.vmem [shape: f32[1,32], index: 7, kind: input, shape index: {}]   ;;  %s890_s8 = inlined_call_operand.<no memory space> [shape: f32[1,1], index: 8, kind: input, shape index: {}]   ;;  %s891_s9 = inlined_call_operand.vmem [shape: f32[8,1], index: 9, kind: output, shape index: {0}]   ;;  %s892_s10 = inlined_call_operand.hbm [shape: f32[8,32], index: 10, kind: output, shape index: {1}]  }
   0x1   :  { %v16_v0 = vstv %s890_s8 }
   0x2   :  { %17 = vst [vmem:[#allocation2] sm:$0x1] %v16_v0 }
   0x3   :  { %18 = vsyncpa [#allocation4], 0 }
   0x4   :  { %19 = vsyncpa [#allocation7], 0 }
   0x5   :  { %20 = vsyncpa [#allocation10], 0 }
   0x6   :  { %21 = vsyncpa [#allocation5], 0  ;;  %s699_s15 = smov [#allocation6]   ;;  %s700_s17 = smov [#allocation3]  }
   0x7   :  { %s40_s16 = sshll.u32 %s699_s15, 4  ;;  %s27_s18 = sshll.u32 %s700_s17, 4  ;;  %s41_s16 = int_to_ptr.vmem [resolvable:$true] %s40_s16  ;;  %s769_s18 = int_to_ptr.vmem [resolvable:$true] %s27_s18 }
   0x8   :  { %s581_s21 = scalar_lea.hbm %s883_s1, 128 }
   0x9   :  { %p582_p0 = scmp.ne.s32.totalorder %s883_s1, %s581_s21  ;;  %p585_p1 = scmp.lt.u32.totalorder %s581_s21, %s883_s1 }
   0xb   :  { %p587_p2 = pnand %p585_p1, %p582_p0 }
   0xd   :  { %590 = shalt.err (!%p587_p2)
}
   0xe   :  { %s591_s25 = scalar_lea.vmem %s41_s16, 128  ;;  %p596_p4 = scmp.lt.s32.totalorder %s41_s16, %s41_s16 }
   0xf   :  { %p592_p3 = scmp.ne.s32.totalorder %s41_s16, %s591_s25  ;;  %p597_p5 = scmp.lt.s32.totalorder %s591_s25, %s591_s25 }
  0x11   :  { %p598_p6 = por %p597_p5, %p596_p4 }
  0x13   :  { %p599_p7 = pnand %p598_p6, %p592_p3 }
  0x15   :  { %602 = shalt.err (!%p599_p7)
}
  0x16   :  { %43 = dma.hbm_to_vmem [thread:$0]  %s883_s1, 128, %s41_s16, [#allocation7]  }
  0x17   :  { %s603_s30 = scalar_lea.hbm %s882_s0, 512 }
  0x18   :  { %p604_p8 = scmp.ne.s32.totalorder %s882_s0, %s603_s30  ;;  %p607_p9 = scmp.lt.u32.totalorder %s603_s30, %s882_s0 }
  0x1a   :  { %p609_p10 = pnand %p607_p9, %p604_p8 }
  0x1c   :  { %612 = shalt.err (!%p609_p10)
}
  0x1d   :  { %s613_s15 = scalar_lea.vmem %s769_s18, 512  ;;  %p618_p12 = scmp.lt.s32.totalorder %s769_s18, %s769_s18 }
  0x1e   :  { %p614_p11 = scmp.ne.s32.totalorder %s769_s18, %s613_s15  ;;  %p619_p13 = scmp.lt.s32.totalorder %s613_s15, %s613_s15 }
  0x20   :  { %p620_p0 = por %p619_p13, %p618_p12 }
  0x22   :  { %p621_p1 = pnand %p620_p0, %p614_p11 }
  0x24   :  { %624 = shalt.err (!%p621_p1)
}
  0x25   :  { %s701_s1 = smov 64   ;;  %s702_s16 = smov 4  }
  0x26   :  { %33 = dma.hbm_to_vmem [thread:$0]  %s882_s0, 512, %s769_s18, [#allocation4], %s701_s1, %s701_s1, %s702_s16  }
  0x27   :  { %s703_s20 = smov [#allocation8]   ;;  %s625_s8 = scalar_lea.hbm %s884_s2, 512 }
  0x28   :  { %s49_s21 = sshll.u32 %s703_s20, 4  ;;  %p626_p2 = scmp.ne.s32.totalorder %s884_s2, %s625_s8  ;;  %s50_s21 = int_to_ptr.vmem [resolvable:$true] %s49_s21 }
  0x29   :  { %p629_p3 = scmp.lt.u32.totalorder %s625_s8, %s884_s2 }
  0x2b   :  { %p631_p4 = pnand %p629_p3, %p626_p2 }
  0x2d   :  { %634 = shalt.err (!%p631_p4)
}
  0x2e   :  { %s635_s28 = scalar_lea.vmem %s50_s21, 512  ;;  %p640_p6 = scmp.lt.s32.totalorder %s50_s21, %s50_s21 }
  0x2f   :  { %p636_p5 = scmp.ne.s32.totalorder %s50_s21, %s635_s28  ;;  %p641_p7 = scmp.lt.s32.totalorder %s635_s28, %s635_s28 }
  0x31   :  { %p642_p8 = por %p641_p7, %p640_p6 }
  0x33   :  { %p643_p9 = pnand %p642_p8, %p636_p5 }
  0x35   :  { %646 = shalt.err (!%p643_p9)
}
  0x36   :  { %s704_s0 = smov 128   ;;  %s705_s18 = smov 8  }
  0x37   :  { %55 = dma.hbm_to_vmem [thread:$0]  %s884_s2, 512, %s50_s21, [#allocation7], %s704_s0, %s704_s0, %s705_s18  }
  0x38   :  { %s706_s11 = smov [#allocation9]   ;;  %s647_s15 = scalar_lea.hbm %s886_s4, 512 }
  0x39   :  { %s63_s12 = sshll.u32 %s706_s11, 4  ;;  %p648_p10 = scmp.ne.s32.totalorder %s886_s4, %s647_s15  ;;  %s64_s12 = int_to_ptr.vmem [resolvable:$true] %s63_s12 }
  0x3a   :  { %p651_p11 = scmp.lt.u32.totalorder %s647_s15, %s886_s4 }
  0x3c   :  { %p653_p12 = pnand %p651_p11, %p648_p10 }
  0x3e   :  { %656 = shalt.err (!%p653_p12)
}
  0x3f   :  { %s657_s20 = scalar_lea.vmem %s64_s12, 512  ;;  %p662_p0 = scmp.lt.s32.totalorder %s64_s12, %s64_s12 }
  0x40   :  { %p658_p13 = scmp.ne.s32.totalorder %s64_s12, %s657_s20  ;;  %p663_p1 = scmp.lt.s32.totalorder %s657_s20, %s657_s20 }
  0x42   :  { %p664_p2 = por %p663_p1, %p662_p0 }
  0x44   :  { %p665_p3 = pnand %p664_p2, %p658_p13 }
  0x46   :  { %668 = shalt.err (!%p665_p3)
}
  0x47   :  { %69 = dma.hbm_to_vmem [thread:$0]  %s886_s4, 512, %s64_s12, [#allocation10], %s704_s0, %s704_s0, %s705_s18  }
  0x48   :  { %691 = dma.done.wait [#allocation4], 512  }
  0x49   :  { %692 = vsyncadd [#allocation4], 4294966784 }
  0x4a   :  { %693 = dma.done.wait [#allocation7], 640  }
  0x4b   :  { %694 = vsyncadd [#allocation7], 4294966656 }
  0x4c   :  { %695 = dma.done.wait [#allocation10], 512  }
  0x4d   :  { %696 = vsyncadd [#allocation10], 4294966784  ;;  %v707_v1 = vmov 0.0|0.0   ;;  %vm708_vm0 = vmmov 0   ;;  %v709_v2 = vmov 0.0   ;;  %v163_v3 = vld [vmem:[#allocation8] sm:$0xff] }
  0x4e   :  { %550 = vmatprep.subr.bf16.mxu0 %v707_v1  ;;  %529 = vmatprep.mubr.msk.f32.mxu0 %vm708_vm0, %v709_v2  ;;  %v164_v4 = vld [vmem:[#allocation8 + $0x8] sm:$0xff]  ;;  %v165_v5 = vld [vmem:[#allocation8 + $0x10] sm:$0xff]  ;;  %v166_v7 = vld [vmem:[#allocation8 + $0x18] sm:$0xff]  ;;  %vm106_vm1 = vcmask 261120   ;;  %vm182_vm2 = vcmask 1041409   ;;  %vm184_vm3 = vcmask 1042434  }
  0x4f   :  { %556 = vmatprep.subr.bf16.mxu1 %v707_v1  ;;  %536 = vmatprep.mubr.msk.f32.mxu1 %vm708_vm0, %v709_v2  ;;  %v551_v6 = vpack.c.bf16 %v164_v4, %v163_v3  ;;  %v490_v8 = vld [vmem:[#allocation3] sm:$0xff]   ;;  %v505_v9 = vld [vmem:[#allocation3 + $0x8] sm:$0xff]   ;;  %v554_v10 = vpack.c.bf16 %v166_v7, %v165_v5  ;;  %v506_v14 = vld [vmem:[#allocation3 + $0x10] sm:$0xff]   ;;  %vm186_vm4 = vcmask 1043459   ;;  %vm188_vm5 = vcmask 1044484   ;;  %s710_s28 = smov [#allocation11]  }
  0x50   :  { %v491_v11 = vunpack.c.l.bf16 %v490_v8  ;;  %v492_v12 = vunpack.c.h.bf16 %v490_v8  ;;  %v495_v13 = vunpack.c.l.bf16 %v505_v9  ;;  %v507_v15 = vld [vmem:[#allocation3 + $0x18] sm:$0xff]   ;;  %v496_v16 = vunpack.c.h.bf16 %v505_v9  ;;  %v275_v3 = vld [vmem:[%s887_s5 + $0x8] sm:$0xff]  ;;  %s468_s0 = sshll.u32 %s710_s28, 4  ;;  %s469_s0 = int_to_ptr.vmem [resolvable:$true] %s468_s0 }
  0x51   :  { %552 = vmatpush3.bf16.msra.mxu0 %v551_v6  ;;  %v499_v17 = vunpack.c.l.bf16 %v506_v14  ;;  %v500_v18 = vunpack.c.h.bf16 %v506_v14  ;;  %v503_v19 = vunpack.c.l.bf16 %v507_v15  ;;  %v504_v20 = vunpack.c.h.bf16 %v507_v15  ;;  %v274_v0 = vld [vmem:[%s887_s5] sm:$0xff]  ;;  %s669_s18 = scalar_lea.vmem %s469_s0, 128  ;;  %p674_p5 = scmp.lt.s32.totalorder %s469_s0, %s469_s0 }
  0x52   :  { %553 = vmatprep.subr.bf16.mxu0 %v707_v1  ;;  %v107_v21 = vsel %vm106_vm1, %v491_v11, 0.0  ;;  %v114_v22 = vsel %vm106_vm1, %v492_v12, 0.0  ;;  %v121_v23 = vsel %vm106_vm1, %v495_v13, 0.0  ;;  %v128_v27 = vsel %vm106_vm1, %v496_v16, 0.0  ;;  %v269_v12 = vld [vmem:[#allocation9] sm:$0xff]  ;;  %v270_v13 = vld [vmem:[#allocation9 + $0x8] sm:$0xff]  ;;  %p670_p4 = scmp.ne.s32.totalorder %s469_s0, %s669_s18  ;;  %p675_p6 = scmp.lt.s32.totalorder %s669_s18, %s669_s18 }
  0x53   :  { %v108_v24 = vrot.slane %v107_v21, 4  ;;  %v115_v25 = vrot.slane %v114_v22, 4  ;;  %v122_v26 = vrot.slane %v121_v23, 4  ;;  %v129_v28 = vrot.slane %v128_v27, 4 }
  0x54   :  { %v135_v29 = vsel %vm106_vm1, %v499_v17, 0.0  ;;  %v142_v30 = vsel %vm106_vm1, %v500_v18, 0.0  ;;  %v149_v31 = vsel %vm106_vm1, %v503_v19, 0.0  ;;  %v156_v39 = vsel %vm106_vm1, %v504_v20, 0.0  ;;  %p676_p7 = por %p675_p6, %p674_p5 }
  0x55   :  { %555 = vmatpush3.bf16.msra.mxu0 %v554_v10  ;;  %v109_v32 = vadd.f32 %v108_v24, %v107_v21  ;;  %v116_v33 = vadd.f32 %v115_v25, %v114_v22  ;;  %v123_v34 = vadd.f32 %v122_v26, %v121_v23  ;;  %v136_v35 = vrot.slane %v135_v29, 4  ;;  %v273_v22 = vld [vmem:[#allocation6] sm:$0xff] }
  0x56   :  { %v130_v36 = vadd.f32 %v129_v28, %v128_v27  ;;  %v143_v37 = vrot.slane %v142_v30, 4  ;;  %v150_v38 = vrot.slane %v149_v31, 4  ;;  %v157_v47 = vrot.slane %v156_v39, 4  ;;  %p677_p8 = pnand %p676_p7, %p670_p4 }
  0x57   :  { %v110_v40 = vrot.slane %v109_v32, 2  ;;  %v117_v41 = vrot.slane %v116_v33, 2  ;;  %v124_v42 = vrot.slane %v123_v34, 2  ;;  %v137_v43 = vadd.f32 %v136_v35, %v135_v29  ;;  %v271_v29 = vld [vmem:[#allocation9 + $0x10] sm:$0xff] }
  0x58   :  { %v131_v44 = vrot.slane %v130_v36, 2  ;;  %v144_v45 = vadd.f32 %v143_v37, %v142_v30  ;;  %v151_v46 = vadd.f32 %v150_v38, %v149_v31  ;;  %v158_v55 = vadd.f32 %v157_v47, %v156_v39  ;;  %v272_v30 = vld [vmem:[#allocation9 + $0x18] sm:$0xff] }
  0x59   :  { %v111_v48 = vadd.f32 %v110_v40, %v109_v32  ;;  %v118_v49 = vadd.f32 %v117_v41, %v116_v33  ;;  %v125_v50 = vadd.f32 %v124_v42, %v123_v34  ;;  %v138_v51 = vrot.slane %v137_v43, 2  ;;  %v481_v32 = vld [vmem:[%s885_s3] ss:$0 sm:$0xff] }
  0x5a   :  { %v132_v52 = vadd.f32 %v131_v44, %v130_v36  ;;  %v145_v53 = vrot.slane %v144_v45, 2  ;;  %v152_v54 = vrot.slane %v151_v46, 2  ;;  %v159_v63 = vrot.slane %v158_v55, 2  ;;  %v486_v42 = vld [vmem:[%s889_s7] ss:$0 sm:$0xff] }
  0x5b   :  { %v112_v56 = vrot.slane %v111_v48, 1  ;;  %v119_v57 = vrot.slane %v118_v49, 1  ;;  %v126_v58 = vrot.slane %v125_v50, 1  ;;  %v139_v59 = vadd.f32 %v138_v51, %v137_v43 }
  0x5c   :  { %v133_v60 = vrot.slane %v132_v52, 1  ;;  %v146_v61 = vadd.f32 %v145_v53, %v144_v45  ;;  %v153_v62 = vadd.f32 %v152_v54, %v151_v46  ;;  %v160_v11 = vadd.f32 %v159_v63, %v158_v55 }
  0x5d   :  { %v113_v4 = vadd.f32 %v112_v56, %v111_v48  ;;  %v120_v5 = vadd.f32 %v119_v57, %v118_v49  ;;  %v127_v6 = vadd.f32 %v126_v58, %v125_v50  ;;  %v140_v7 = vrot.slane %v139_v59, 1 }
  0x5e   :  { %v134_v8 = vadd.f32 %v133_v60, %v132_v52  ;;  %v147_v9 = vrot.slane %v146_v61, 1  ;;  %v154_v10 = vrot.slane %v153_v62, 1  ;;  %vm190_vm6 = vcmask 1045509  }
  0x5f   :  { %v141_v14 = vadd.f32 %v140_v7, %v139_v59  ;;  %v183_v15 = vsel %vm182_vm2, %v120_v5, %v113_v4  ;;  %v557_v16 = vpack.c.bf16 %v275_v3, %v274_v0  ;;  %v161_v19 = vrot.slane %v160_v11, 1 }
  0x60   :  { %v148_v17 = vadd.f32 %v147_v9, %v146_v61  ;;  %v155_v18 = vadd.f32 %v154_v10, %v153_v62  ;;  %v185_v20 = vsel %vm184_vm3, %v127_v6, %v183_v15  ;;  %vm192_vm7 = vcmask 1046534  }
  0x61   :  { %v187_v21 = vsel %vm186_vm4, %v134_v8, %v185_v20  ;;  %558 = vmatpush3.bf16.msra.mxu1 %v557_v16  ;;  %vm276_vm8 = vcmask 130048   ;;  %v560_v23 = vpack.c.bf16 %v270_v13, %v269_v12  ;;  %v162_v24 = vadd.f32 %v161_v19, %v160_v11 }
  0x62   :  { %v189_v25 = vsel %vm188_vm5, %v141_v14, %v187_v21  ;;  %vm194_vm9 = vcmask 1047559   ;;  %559 = vmatprep.subr.bf16.mxu1 %v707_v1  ;;  %v563_v31 = vpack.c.bf16 %v272_v30, %v271_v29 }
  0x63   :  { %v191_v26 = vsel %vm190_vm6, %v148_v17, %v189_v25 }
  0x64   :  { %v193_v27 = vsel %vm192_vm7, %v155_v18, %v191_v26  ;;  %537 = vmatmul.mubr.msk.f32.vlgmr.msra.gmra.mrb[0].mxu1 %vm276_vm8, %v273_v22 }
  0x65   :  { %v195_v28 = vsel %vm194_vm9, %v162_v24, %v193_v27  ;;  %561 = vmatpush3.bf16.msra.mxu1 %v560_v23  ;;  %547 = vmatprep.mubr.msk.f32.mxu1 %vm708_vm0, %v709_v2 }
  0x66   :  { %530 = vmatmul.mubr.msk.f32.vlgmr.msra.gmra.mrb[0].mxu0 %vm106_vm1, %v195_v28  ;;  %562 = vmatprep.subr.bf16.mxu1 %v707_v1  ;;  %v485_v1 = vld [vmem:[%s888_s6] ss:$0 sm:$0xff] }
  0x69   :  { %564 = vmatpush3.bf16.msra.mxu1 %v563_v31 }
 0x137   :  { %v346_v33 = vpop.f32.mrb[0].mxu1 }
 0x138   :  { %v538_v34 = vpop.f32.mrb[1].mxu1 }
 0x139   :  { %v264_v35 = vpop.f32.mrb[0].mxu0 }
 0x13a   :  { %v265_v36 = vadd.f32 %v481_v32, %v264_v35  ;;  %v531_v37 = vpop.f32.mrb[1].mxu0 }
 0x13c   :  { %v268_v38 = vmax.f32 %v265_v36, 0.0 }
 0x13e   :  { %459 = vst.msk [vmem:[#allocation11] sm:$0xff] %vm106_vm1, %v268_v38  ;;  %548 = vmatmul.mubr.msk.f32.vlgmr.msra.gmra.mrb[2].mxu1 %vm106_vm1, %v268_v38 }
 0x211   :  { %v419_v2 = vpop.f32.mrb[2].mxu1 }
 0x212   :  { %v420_v39 = vadd.f32 %v419_v2, %v346_v33  ;;  %v549_v40 = vpop.f32.mrb[3].mxu1 }
 0x214   :  { %v430_v41 = vadd.f32 %v485_v1, %v420_v39 }
 0x216   :  { %v431_v43 = vmax.f32 %v430_v41, 0.0 }
 0x218   :  { %v439_v44 = vmul.f32 %v486_v42, %v431_v43 }
 0x21a   :  { %v440_v45 = vsel %vm106_vm1, %v439_v44, 0.0 }
 0x21b   :  { %441 = vadd.xlane.f32.xlu0 %v440_v45 }
 0x21c   :  { %680 = shalt.err (!%p677_p8)
}
 0x21d   :  { %s681_s30 = scalar_lea.hbm %s892_s10, 128 }
 0x21e   :  { %p682_p9 = scmp.ne.s32.totalorder %s892_s10, %s681_s30  ;;  %p685_p10 = scmp.lt.u32.totalorder %s681_s30, %s892_s10 }
 0x220   :  { %p687_p11 = pnand %p685_p10, %p682_p9 }
 0x222   :  { %690 = shalt.err (!%p687_p11)
}
 0x223   :  { %471 = dma.vmem_to_hbm [thread:$0]  %s469_s0, 128, %s892_s10, [#allocation5]   ;;  %v487_v46 = vld [vmem:[#allocation2] ss:$0 sm:$0xff]  ;;  %vm457_vm10 = vcmask 7168  }
 0x2a8   :  { %v442_v47 = vpop.xlane.xlu0 %441 }
 0x2a9   :  { %v450_v48 = vadd.f32 %v487_v46, %v442_v47 }
 0x2ab   :  { %v488_v49 = vmul.f32 -1.442695, %v450_v48 }
 0x2ad   :  { %577 = vpow2.f32 %v488_v49 }
 0x2b7   :  { %v578_v50 = vpop.eup %577 }
 0x2b8   :  { %v454_v51 = vadd.f32 1.0, %v578_v50 }
 0x2ba   :  { %579 = vrcp.f32 %v454_v51 }
 0x2c4   :  { %v580_v52 = vpop.eup %579 }
 0x2c5   :  { %458 = vst.msk [vmem:[%s891_s9] sm:$0xff] %vm457_vm10, %v580_v52 }
 0x2c6   :  { %697 = dma.done.wait [#allocation5], 128  }
 0x2c7   :  { %698 = vsyncadd [#allocation5], 4294967168 }
 0x2c8   :  { %477 = vsyncpa [#allocation4], 1 }
 0x2c9   :  { %478 = vsyncpa [#allocation7], 1 }
 0x2ca   :  { %479 = vsyncpa [#allocation10], 1 }
 0x2cb   :  { %480 = vsyncpa [#allocation5], 1 }

</bundles_post_ra>
